<compile_context>
chip_gen: v7x
topology: tpu7x:2x2x1
jax: 0.10.0
libtpu: 0.0.40
codegen_flags: <defaults>
</compile_context>

<pallas_src>
import jax
import jax.numpy as jnp
from jax.experimental import pallas as pl
from jax.experimental.pallas import tpu as pltpu


# --------------------------------------------------------------------------
# Kernel 1: fused 1x1 conv (+folded BN) + LeakyReLU for conv1 and convAtt.
# x is presented as (B, C, HW_pad) so HW sits on the lane axis (lane-dense).
# --------------------------------------------------------------------------
def conv_bn_lrelu_dual_kernel(x_ref, w1_ref, b1_ref, wa_ref, ba_ref,
                              c1_ref, c2_ref):
    # x_ref: (1, C, T)   w1_ref: (1, C)  b1_ref: (1, 1)
    # wa_ref: (C, C)     ba_ref: (C, 1)
    # c1_ref: (1, 1, T)  c2_ref: (1, C, T)
    x = x_ref[0].astype(jnp.float32)                                  # (C, T)

    z1 = jnp.dot(w1_ref[...], x, preferred_element_type=jnp.float32) + b1_ref[...]
    c1 = jnp.maximum(z1, 0.2 * z1)                                    # LeakyReLU(0.2)

    za = jnp.dot(wa_ref[...], x, preferred_element_type=jnp.float32) + ba_ref[...]
    c2 = jnp.maximum(za, 0.2 * za)

    c1_ref[0] = c1.astype(c1_ref.dtype)
    c2_ref[0] = c2.astype(c2_ref.dtype)


# --------------------------------------------------------------------------
# Kernel 2: per-batch second-order attention (Gram matrices, softmax, matmuls).
# --------------------------------------------------------------------------
def soam_attention_kernel(c1_ref, r1_ref, r2_ref,
                          s1_ref, s2_ref, m1_ref, m2_ref):
    # c1_ref: (1, H, W)  r1_ref: (1, H, C*W)  r2_ref: (1, W, C*H)
    c1 = c1_ref[0].astype(jnp.float32)                                # (H, W)
    c1t = c1.T                                                        # (W, H)

    d1 = jnp.dot(c1, c1t, preferred_element_type=jnp.float32)         # (H, H)
    d2 = jnp.dot(c1t, c1, preferred_element_type=jnp.float32)         # (W, W)

    def softmax(d):
        m = jnp.max(d, axis=-1, keepdims=True)
        e = jnp.exp(d - m)
        return e / jnp.sum(e, axis=-1, keepdims=True)

    s1 = softmax(d1)
    s2 = softmax(d2)

    m1 = jnp.dot(s1, r1_ref[0].astype(jnp.float32),
                 preferred_element_type=jnp.float32)                  # (H, C*W)
    m2 = jnp.dot(s2, r2_ref[0].astype(jnp.float32),
                 preferred_element_type=jnp.float32)                  # (W, C*H)

    s1_ref[0] = s1.astype(s1_ref.dtype)
    s2_ref[0] = s2.astype(s2_ref.dtype)
    m1_ref[0] = m1.astype(m1_ref.dtype)
    m2_ref[0] = m2.astype(m2_ref.dtype)


# --------------------------------------------------------------------------
# Kernel 3: out = C2 + LeakyReLU(BNOut(ConvOut(R3 + R4))) (streamed, fused).
# --------------------------------------------------------------------------
def output_fuse_kernel(r3_ref, r4_ref, c2_ref, wo_ref, bo_ref, o_ref):
    # r3/r4/c2_ref: (1, C, T)  wo_ref: (C, C)  bo_ref: (C, 1)  o_ref: (1, C, T)
    s = r3_ref[0].astype(jnp.float32) + r4_ref[0].astype(jnp.float32)  # (C, T)
    z = jnp.dot(wo_ref[...], s, preferred_element_type=jnp.float32) + bo_ref[...]
    c3 = jnp.maximum(z, 0.2 * z)
    o_ref[0] = (c2_ref[0].astype(jnp.float32) + c3).astype(o_ref.dtype)


# --------------------------------------------------------------------------
# Host-side wrapper.
# --------------------------------------------------------------------------
def fold_conv_bn(w, b, gamma, beta, mean, var, eps=1e-5):
    """Fold eval-mode BatchNorm into a 1x1 conv. Returns (Cout,Cin) weight, (Cout,) bias."""
    cout, cin = w.shape[0], w.shape[1]
    scale = gamma / jnp.sqrt(var + eps)
    w_eff = w.reshape(cout, cin) * scale[:, None]
    b_eff = (b - mean) * scale + beta
    return w_eff.astype(jnp.float32), b_eff.astype(jnp.float32)


def soam_forward(x, params, hw_tile_max=1024):
    B, C, H, W = x.shape
    HW = H * W

    w1e, b1e = fold_conv_bn(params['conv1_w'], params['conv1_b'],
                            params['bn1_g'], params['bn1_b'],
                            params['bn1_m'], params['bn1_v'])
    wae, bae = fold_conv_bn(params['convAtt_w'], params['convAtt_b'],
                            params['bnAtt_g'], params['bnAtt_b'],
                            params['bnAtt_m'], params['bnAtt_v'])
    woe, boe = fold_conv_bn(params['convOut_w'], params['convOut_b'],
                            params['bnOut_g'], params['bnOut_b'],
                            params['bnOut_m'], params['bnOut_v'])

    # Lane-dense spatial tiling: HW padded to a multiple of 128, tiles <= 1024 lanes.
    hw_tile = min(hw_tile_max, pl.cdiv(HW, 128) * 128)
    HW_pad = pl.cdiv(HW, hw_tile) * hw_tile
    n_hw = HW_pad // hw_tile

    x_flat = x.reshape(B, C, HW)
    if HW_pad != HW:
        x_flat = jnp.pad(x_flat, ((0, 0), (0, 0), (0, HW_pad - HW)))

    # ---- Kernel 1: one streaming pass over x producing C1 and C2 ----------
    c1_flat, c2_flat = pl.pallas_call(
        conv_bn_lrelu_dual_kernel,
        out_shape=(jax.ShapeDtypeStruct((B, 1, HW_pad), x.dtype),
                   jax.ShapeDtypeStruct((B, C, HW_pad), x.dtype)),
        grid_spec=pltpu.PrefetchScalarGridSpec(
            num_scalar_prefetch=0,
            grid=(B, n_hw),
            in_specs=[
                pl.BlockSpec((1, C, hw_tile), lambda b, t: (b, 0, t)),
                pl.BlockSpec((1, C), lambda b, t: (0, 0)),
                pl.BlockSpec((1, 1), lambda b, t: (0, 0)),
                pl.BlockSpec((C, C), lambda b, t: (0, 0)),
                pl.BlockSpec((C, 1), lambda b, t: (0, 0)),
            ],
            out_specs=[
                pl.BlockSpec((1, 1, hw_tile), lambda b, t: (b, 0, t)),
                pl.BlockSpec((1, C, hw_tile), lambda b, t: (b, 0, t)),
            ],
        ),
        compiler_params=pltpu.CompilerParams(
            dimension_semantics=("parallel", "parallel")),
        cost_estimate=pl.CostEstimate(
            flops=2 * B * HW_pad * C * (C + 1),
            transcendentals=0,
            bytes_accessed=4 * B * HW_pad * (2 * C + 1)),
    )(x_flat, w1e, b1e.reshape(1, 1), wae, bae.reshape(C, 1))

    # Layout plumbing (pure reshapes, handled by XLA outside the kernels).
    C1 = c1_flat[:, 0, :HW].reshape(B, H, W)
    C2_flat_valid = c2_flat[:, :, :HW]
    C2 = C2_flat_valid.reshape(B, C, H, W)
    R1 = C2.reshape(B, H, C * W)       # same row-major reshape as torch.reshape
    R2 = C2.reshape(B, W, C * H)

    # ---- Kernel 2: second-order attention, one batch element per grid step ----
    S1, S2, M1, M2 = pl.pallas_call(
        soam_attention_kernel,
        out_shape=(jax.ShapeDtypeStruct((B, H, H), x.dtype),
                   jax.ShapeDtypeStruct((B, W, W), x.dtype),
                   jax.ShapeDtypeStruct((B, H, C * W), x.dtype),
                   jax.ShapeDtypeStruct((B, W, C * H), x.dtype)),
        grid_spec=pltpu.PrefetchScalarGridSpec(
            num_scalar_prefetch=0,
            grid=(B,),
            in_specs=[
                pl.BlockSpec((1, H, W), lambda b: (b, 0, 0)),
                pl.BlockSpec((1, H, C * W), lambda b: (b, 0, 0)),
                pl.BlockSpec((1, W, C * H), lambda b: (b, 0, 0)),
            ],
            out_specs=[
                pl.BlockSpec((1, H, H), lambda b: (b, 0, 0)),
                pl.BlockSpec((1, W, W), lambda b: (b, 0, 0)),
                pl.BlockSpec((1, H, C * W), lambda b: (b, 0, 0)),
                pl.BlockSpec((1, W, C * H), lambda b: (b, 0, 0)),
            ],
        ),
        compiler_params=pltpu.CompilerParams(
            dimension_semantics=("parallel",)),
        cost_estimate=pl.CostEstimate(
            flops=2 * B * (H * W * H + W * H * W + H * H * C * W + W * W * C * H),
            transcendentals=B * (H * H + W * W),
            bytes_accessed=4 * B * (H * W + 2 * (H * C * W + W * C * H)
                                    + H * H + W * W)),
    )(C1, R1, R2)

    # torch: R3 = M1.reshape(B,C,H,W); R4 = M2.reshape(B,C,H,W)
    R3 = M1.reshape(B, C, HW)
    R4 = M2.reshape(B, C, HW)
    if HW_pad != HW:
        R3 = jnp.pad(R3, ((0, 0), (0, 0), (0, HW_pad - HW)))
        R4 = jnp.pad(R4, ((0, 0), (0, 0), (0, HW_pad - HW)))

    # ---- Kernel 3: fused (R3+R4) -> conv+BN+LeakyReLU -> +C2 ----------------
    out_flat = pl.pallas_call(
        output_fuse_kernel,
        out_shape=jax.ShapeDtypeStruct((B, C, HW_pad), x.dtype),
        grid_spec=pltpu.PrefetchScalarGridSpec(
            num_scalar_prefetch=0,
            grid=(B, n_hw),
            in_specs=[
                pl.BlockSpec((1, C, hw_tile), lambda b, t: (b, 0, t)),
                pl.BlockSpec((1, C, hw_tile), lambda b, t: (b, 0, t)),
                pl.BlockSpec((1, C, hw_tile), lambda b, t: (b, 0, t)),
                pl.BlockSpec((C, C), lambda b, t: (0, 0)),
                pl.BlockSpec((C, 1), lambda b, t: (0, 0)),
            ],
            out_specs=pl.BlockSpec((1, C, hw_tile), lambda b, t: (b, 0, t)),
        ),
        compiler_params=pltpu.CompilerParams(
            dimension_semantics=("parallel", "parallel")),
        cost_estimate=pl.CostEstimate(
            flops=2 * B * HW_pad * C * C + 3 * B * C * HW_pad,
            transcendentals=0,
            bytes_accessed=4 * B * C * HW_pad * 4),
    )(R3, R4, c2_flat, woe, boe.reshape(C, 1))

    out = out_flat[:, :, :HW].reshape(B, C, H, W)
    return out, S1, S2


# --------------------------------------------------------------------------
# Pure-JAX reference (eval-mode BatchNorm), matching the PyTorch forward.
# --------------------------------------------------------------------------
def soam_ref(x, params, eps=1e-5):
    B, C, H, W = x.shape
    hi = jax.lax.Precision.HIGHEST

    def conv_bn_lrelu(inp, w, b, gamma, beta, mean, var):
        cout, cin = w.shape[0], w.shape[1]
        y = jnp.einsum('oc,bchw->bohw', w.reshape(cout, cin), inp,
                       precision=hi) + b.reshape(1, cout, 1, 1)
        scale = (gamma / jnp.sqrt(var + eps)).reshape(1, cout, 1, 1)
        y = (y - mean.reshape(1, cout, 1, 1)) * scale + beta.reshape(1, cout, 1, 1)
        return jnp.maximum(y, 0.2 * y)

    C1 = conv_bn_lrelu(x, params['conv1_w'], params['conv1_b'],
                       params['bn1_g'], params['bn1_b'],
                       params['bn1_m'], params['bn1_v']).reshape(B, H, W)
    C1t = jnp.swapaxes(C1, 1, 2)
    S1 = jax.nn.softmax(jnp.matmul(C1, C1t, precision=hi), axis=-1)
    S2 = jax.nn.softmax(jnp.matmul(C1t, C1, precision=hi), axis=-1)

    C2 = conv_bn_lrelu(x, params['convAtt_w'], params['convAtt_b'],
                       params['bnAtt_g'], params['bnAtt_b'],
                       params['bnAtt_m'], params['bnAtt_v'])
    R1 = C2.reshape(B, H, C * W)
    R2 = C2.reshape(B, W, C * H)
    M1 = jnp.matmul(S1, R1, precision=hi)
    M2 = jnp.matmul(S2, R2, precision=hi)
    R3 = M1.reshape(B, C, H, W)
    R4 = M2.reshape(B, C, H, W)
    C3 = conv_bn_lrelu(R3 + R4, params['convOut_w'], params['convOut_b'],
                       params['bnOut_g'], params['bnOut_b'],
                       params['bnOut_m'], params['bnOut_v'])
    return C2 + C3, S1, S2


if __name__ == "__main__":
    B, C, H, W = 2, 4, 16, 16

    ks = jax.random.split(jax.random.PRNGKey(0), 19)
    x = jax.random.normal(ks[0], (B, C, H, W), dtype=jnp.float32)

    def bn_params(i, n):
        return (1.0 + 0.1 * jax.random.normal(ks[i], (n,), jnp.float32),    # gamma
                0.1 * jax.random.normal(ks[i + 1], (n,), jnp.float32),       # beta
                0.1 * jax.random.normal(ks[i + 2], (n,), jnp.float32),       # running_mean
                0.5 + jax.random.uniform(ks[i + 3], (n,), jnp.float32))      # running_var

    params = {
        'conv1_w': 0.3 * jax.random.normal(ks[1], (1, C, 1, 1), jnp.float32),
        'conv1_b': 0.1 * jax.random.normal(ks[2], (1,), jnp.float32),
        'convAtt_w': 0.3 * jax.random.normal(ks[7], (C, C, 1, 1), jnp.float32),
        'convAtt_b': 0.1 * jax.random.normal(ks[8], (C,), jnp.float32),
        'convOut_w': 0.3 * jax.random.normal(ks[13], (C, C, 1, 1), jnp.float32),
        'convOut_b': 0.1 * jax.random.normal(ks[14], (C,), jnp.float32),
    }
    params['bn1_g'], params['bn1_b'], params['bn1_m'], params['bn1_v'] = bn_params(3, 1)
    (params['bnAtt_g'], params['bnAtt_b'],
     params['bnAtt_m'], params['bnAtt_v']) = bn_params(9, C)
    (params['bnOut_g'], params['bnOut_b'],
     params['bnOut_m'], params['bnOut_v']) = bn_params(15, C)

    soam_jit = jax.jit(soam_forward)
    out, S1, S2 = soam_jit(x, params)
    out = jax.block_until_ready(out)

    ref_out, ref_S1, ref_S2 = soam_ref(x, params)

    assert out.shape == (B, C, H, W)
    assert S1.shape == (B, H, H) and S2.shape == (B, W, W)
    for got, ref in ((out, ref_out), (S1, ref_S1), (S2, ref_S2)):
        assert jnp.allclose(got, ref, atol=1e-4, rtol=1e-4), \
            float(jnp.max(jnp.abs(got - ref)))

    print("KERNEL_OK")
</pallas_src>

<mosaic_0001>
module attributes {stable_mosaic.version = 11 : i64} {
  func.func @conv_bn_lrelu_dual_kernel(%arg0: i32, %arg1: i32, %arg2: memref<1x4x256xf32, #tpu.memory_space<vmem>>, %arg3: memref<1x4xf32, #tpu.memory_space<vmem>>, %arg4: memref<1x1xf32, #tpu.memory_space<vmem>>, %arg5: memref<4x4xf32, #tpu.memory_space<vmem>>, %arg6: memref<4x1xf32, #tpu.memory_space<vmem>>, %arg7: memref<1x1x256xf32, #tpu.memory_space<vmem>>, %arg8: memref<1x4x256xf32, #tpu.memory_space<vmem>>) attributes {dimension_semantics = [#tpu.dimension_semantics<parallel>, #tpu.dimension_semantics<parallel>], iteration_bounds = array<i64: 2, 1>, scalar_prefetch = 0 : i64, scratch_operands = 0 : i64, tpu.core_type = #tpu.core_type<tc>, window_params = [{transform_indices = @transform_0, window_bounds = array<i64: 1, 4, 256>}, {pipeline_mode = #tpu.pipeline_mode<synchronous>, transform_indices = @transform_1, window_bounds = array<i64: 1, 4>}, {pipeline_mode = #tpu.pipeline_mode<synchronous>, transform_indices = @transform_2, window_bounds = array<i64: 1, 1>}, {pipeline_mode = #tpu.pipeline_mode<synchronous>, transform_indices = @transform_3, window_bounds = array<i64: 4, 4>}, {pipeline_mode = #tpu.pipeline_mode<synchronous>, transform_indices = @transform_4, window_bounds = array<i64: 4, 1>}, {transform_indices = @transform_5, window_bounds = array<i64: 1, 1, 256>}, {transform_indices = @transform_6, window_bounds = array<i64: 1, 4, 256>}]} {
    %c0 = arith.constant 0 : index
    %c0_0 = arith.constant 0 : index
    %c0_1 = arith.constant 0 : index
    %0 = vector.load %arg2[%c0, %c0_0, %c0_1] : memref<1x4x256xf32, #tpu.memory_space<vmem>>, vector<1x4x256xf32>
    %1 = vector.shape_cast %0 : vector<1x4x256xf32> to vector<4x256xf32>
    %c0_2 = arith.constant 0 : index
    %c0_3 = arith.constant 0 : index
    %2 = vector.load %arg3[%c0_2, %c0_3] : memref<1x4xf32, #tpu.memory_space<vmem>>, vector<1x4xf32>
    %cst = arith.constant dense<0.000000e+00> : vector<1x256xf32>
    %3 = tpu.matmul %2, %1, %cst {dimension_numbers = #tpu.dot_dimension_numbers<[1], [0], [0], [1], [0, 0, 1, 1], [], []>} : vector<1x4xf32>, vector<4x256xf32>, vector<1x256xf32> -> vector<1x256xf32>
    %c0_4 = arith.constant 0 : index
    %c0_5 = arith.constant 0 : index
    %4 = vector.load %arg4[%c0_4, %c0_5] : memref<1x1xf32, #tpu.memory_space<vmem>>, vector<1x1xf32>
    %5 = vector.broadcast %4 : vector<1x1xf32> to vector<1x256xf32>
    %6 = arith.addf %3, %5 : vector<1x256xf32>
    %cst_6 = arith.constant 2.000000e-01 : f32
    %7 = vector.broadcast %cst_6 : f32 to vector<1x256xf32>
    %8 = arith.mulf %7, %6 : vector<1x256xf32>
    %9 = arith.maximumf %6, %8 : vector<1x256xf32>
    %c0_7 = arith.constant 0 : index
    %c0_8 = arith.constant 0 : index
    %10 = vector.load %arg5[%c0_7, %c0_8] : memref<4x4xf32, #tpu.memory_space<vmem>>, vector<4x4xf32>
    %cst_9 = arith.constant dense<0.000000e+00> : vector<4x256xf32>
    %11 = tpu.matmul %10, %1, %cst_9 {dimension_numbers = #tpu.dot_dimension_numbers<[1], [0], [0], [1], [0, 0, 1, 1], [], []>} : vector<4x4xf32>, vector<4x256xf32>, vector<4x256xf32> -> vector<4x256xf32>
    %c0_10 = arith.constant 0 : index
    %c0_11 = arith.constant 0 : index
    %12 = vector.load %arg6[%c0_10, %c0_11] : memref<4x1xf32, #tpu.memory_space<vmem>>, vector<4x1xf32>
    %13 = vector.broadcast %12 : vector<4x1xf32> to vector<4x256xf32>
    %14 = arith.addf %11, %13 : vector<4x256xf32>
    %cst_12 = arith.constant 2.000000e-01 : f32
    %15 = vector.broadcast %cst_12 : f32 to vector<4x256xf32>
    %16 = arith.mulf %15, %14 : vector<4x256xf32>
    %17 = arith.maximumf %14, %16 : vector<4x256xf32>
    %c0_13 = arith.constant 0 : index
    %c0_14 = arith.constant 0 : index
    %c0_15 = arith.constant 0 : index
    %18 = vector.load %arg7[%c0_13, %c0_14, %c0_15] : memref<1x1x256xf32, #tpu.memory_space<vmem>>, vector<1x1x256xf32>
    %19 = vector.shape_cast %18 : vector<1x1x256xf32> to vector<1x256xf32>
    %20 = vector.shape_cast %9 : vector<1x256xf32> to vector<1x1x256xf32>
    tpu.vector_store %arg7[%c0_13, %c0_14, %c0_15], %20 {strides = array<i32>} : memref<1x1x256xf32, #tpu.memory_space<vmem>>, vector<1x1x256xf32>,
    %c0_16 = arith.constant 0 : index
    %c0_17 = arith.constant 0 : index
    %c0_18 = arith.constant 0 : index
    %21 = vector.load %arg8[%c0_16, %c0_17, %c0_18] : memref<1x4x256xf32, #tpu.memory_space<vmem>>, vector<1x4x256xf32>
    %22 = vector.shape_cast %21 : vector<1x4x256xf32> to vector<4x256xf32>
    %23 = vector.shape_cast %17 : vector<4x256xf32> to vector<1x4x256xf32>
    tpu.vector_store %arg8[%c0_16, %c0_17, %c0_18], %23 {strides = array<i32>} : memref<1x4x256xf32, #tpu.memory_space<vmem>>, vector<1x4x256xf32>,
    return
  }
  func.func @transform_0(%arg0: i32, %arg1: i32) -> (i32, i32, i32) {
    %c0_i32 = arith.constant 0 : i32
    %c0_i32_0 = arith.constant 0 : i32
    return %arg0, %c0_i32, %arg1 : i32, i32, i32
  }
  func.func @transform_1(%arg0: i32, %arg1: i32) -> (i32, i32) {
    %c0_i32 = arith.constant 0 : i32
    %c0_i32_0 = arith.constant 0 : i32
    %c0_i32_1 = arith.constant 0 : i32
    return %c0_i32, %c0_i32_0 : i32, i32
  }
  func.func @transform_2(%arg0: i32, %arg1: i32) -> (i32, i32) {
    %c0_i32 = arith.constant 0 : i32
    %c0_i32_0 = arith.constant 0 : i32
    %c0_i32_1 = arith.constant 0 : i32
    return %c0_i32, %c0_i32_0 : i32, i32
  }
  func.func @transform_3(%arg0: i32, %arg1: i32) -> (i32, i32) {
    %c0_i32 = arith.constant 0 : i32
    %c0_i32_0 = arith.constant 0 : i32
    %c0_i32_1 = arith.constant 0 : i32
    return %c0_i32, %c0_i32_0 : i32, i32
  }
  func.func @transform_4(%arg0: i32, %arg1: i32) -> (i32, i32) {
    %c0_i32 = arith.constant 0 : i32
    %c0_i32_0 = arith.constant 0 : i32
    %c0_i32_1 = arith.constant 0 : i32
    return %c0_i32, %c0_i32_0 : i32, i32
  }
  func.func @transform_5(%arg0: i32, %arg1: i32) -> (i32, i32, i32) {
    %c0_i32 = arith.constant 0 : i32
    %c0_i32_0 = arith.constant 0 : i32
    return %arg0, %c0_i32, %arg1 : i32, i32, i32
  }
  func.func @transform_6(%arg0: i32, %arg1: i32) -> (i32, i32, i32) {
    %c0_i32 = arith.constant 0 : i32
    %c0_i32_0 = arith.constant 0 : i32
    return %arg0, %c0_i32, %arg1 : i32, i32, i32
  }
}

module attributes {stable_mosaic.version = 11 : i64} {
  func.func @soam_attention_kernel(%arg0: i32, %arg1: memref<1x16x16xf32, #tpu.memory_space<vmem>>, %arg2: memref<1x16x64xf32, #tpu.memory_space<vmem>>, %arg3: memref<1x16x64xf32, #tpu.memory_space<vmem>>, %arg4: memref<1x16x16xf32, #tpu.memory_space<vmem>>, %arg5: memref<1x16x16xf32, #tpu.memory_space<vmem>>, %arg6: memref<1x16x64xf32, #tpu.memory_space<vmem>>, %arg7: memref<1x16x64xf32, #tpu.memory_space<vmem>>) attributes {dimension_semantics = [#tpu.dimension_semantics<parallel>], iteration_bounds = array<i64: 2>, scalar_prefetch = 0 : i64, scratch_operands = 0 : i64, tpu.core_type = #tpu.core_type<tc>, window_params = [{transform_indices = @transform_0, window_bounds = array<i64: 1, 16, 16>}, {transform_indices = @transform_1, window_bounds = array<i64: 1, 16, 64>}, {transform_indices = @transform_2, window_bounds = array<i64: 1, 16, 64>}, {transform_indices = @transform_3, window_bounds = array<i64: 1, 16, 16>}, {transform_indices = @transform_4, window_bounds = array<i64: 1, 16, 16>}, {transform_indices = @transform_5, window_bounds = array<i64: 1, 16, 64>}, {transform_indices = @transform_6, window_bounds = array<i64: 1, 16, 64>}]} {
    %c0 = arith.constant 0 : index
    %c0_0 = arith.constant 0 : index
    %c0_1 = arith.constant 0 : index
    %0 = vector.load %arg1[%c0, %c0_0, %c0_1] : memref<1x16x16xf32, #tpu.memory_space<vmem>>, vector<1x16x16xf32>
    %1 = vector.shape_cast %0 : vector<1x16x16xf32> to vector<16x16xf32>
    %2 = tpu.transpose %1, [1, 0] : vector<16x16xf32> -> vector<16x16xf32>
    %cst = arith.constant dense<0.000000e+00> : vector<16x16xf32>
    %3 = tpu.matmul %1, %2, %cst {dimension_numbers = #tpu.dot_dimension_numbers<[1], [0], [0], [1], [0, 0, 1, 1], [], []>} : vector<16x16xf32>, vector<16x16xf32>, vector<16x16xf32> -> vector<16x16xf32>
    %cst_2 = arith.constant dense<0.000000e+00> : vector<16x16xf32>
    %4 = tpu.matmul %2, %1, %cst_2 {dimension_numbers = #tpu.dot_dimension_numbers<[1], [0], [0], [1], [0, 0, 1, 1], [], []>} : vector<16x16xf32>, vector<16x16xf32>, vector<16x16xf32> -> vector<16x16xf32>
    %cst_3 = arith.constant dense<0xFF800000> : vector<16xf32>
    %5 = vector.multi_reduction <maximumf>, %3, %cst_3 [1] : vector<16x16xf32> to vector<16xf32>
    %6 = vector.shape_cast %5 : vector<16xf32> to vector<16x1xf32>
    %7 = vector.broadcast %6 : vector<16x1xf32> to vector<16x16xf32>
    %8 = arith.subf %3, %7 : vector<16x16xf32>
    %9 = math.exp %8 : vector<16x16xf32>
    %cst_4 = arith.constant dense<0.000000e+00> : vector<16xf32>
    %10 = vector.multi_reduction <add>, %9, %cst_4 [1] : vector<16x16xf32> to vector<16xf32>
    %11 = vector.shape_cast %10 : vector<16xf32> to vector<16x1xf32>
    %12 = vector.broadcast %11 : vector<16x1xf32> to vector<16x16xf32>
    %13 = arith.divf %9, %12 : vector<16x16xf32>
    %cst_5 = arith.constant dense<0xFF800000> : vector<16xf32>
    %14 = vector.multi_reduction <maximumf>, %4, %cst_5 [1] : vector<16x16xf32> to vector<16xf32>
    %15 = vector.shape_cast %14 : vector<16xf32> to vector<16x1xf32>
    %16 = vector.broadcast %15 : vector<16x1xf32> to vector<16x16xf32>
    %17 = arith.subf %4, %16 : vector<16x16xf32>
    %18 = math.exp %17 : vector<16x16xf32>
    %cst_6 = arith.constant dense<0.000000e+00> : vector<16xf32>
    %19 = vector.multi_reduction <add>, %18, %cst_6 [1] : vector<16x16xf32> to vector<16xf32>
    %20 = vector.shape_cast %19 : vector<16xf32> to vector<16x1xf32>
    %21 = vector.broadcast %20 : vector<16x1xf32> to vector<16x16xf32>
    %22 = arith.divf %18, %21 : vector<16x16xf32>
    %c0_7 = arith.constant 0 : index
    %c0_8 = arith.constant 0 : index
    %c0_9 = arith.constant 0 : index
    %23 = vector.load %arg2[%c0_7, %c0_8, %c0_9] : memref<1x16x64xf32, #tpu.memory_space<vmem>>, vector<1x16x64xf32>
    %24 = vector.shape_cast %23 : vector<1x16x64xf32> to vector<16x64xf32>
    %cst_10 = arith.constant dense<0.000000e+00> : vector<16x64xf32>
    %25 = tpu.matmul %13, %24, %cst_10 {dimension_numbers = #tpu.dot_dimension_numbers<[1], [0], [0], [1], [0, 0, 1, 1], [], []>} : vector<16x16xf32>, vector<16x64xf32>, vector<16x64xf32> -> vector<16x64xf32>
    %c0_11 = arith.constant 0 : index
    %c0_12 = arith.constant 0 : index
    %c0_13 = arith.constant 0 : index
    %26 = vector.load %arg3[%c0_11, %c0_12, %c0_13] : memref<1x16x64xf32, #tpu.memory_space<vmem>>, vector<1x16x64xf32>
    %27 = vector.shape_cast %26 : vector<1x16x64xf32> to vector<16x64xf32>
    %cst_14 = arith.constant dense<0.000000e+00> : vector<16x64xf32>
    %28 = tpu.matmul %22, %27, %cst_14 {dimension_numbers = #tpu.dot_dimension_numbers<[1], [0], [0], [1], [0, 0, 1, 1], [], []>} : vector<16x16xf32>, vector<16x64xf32>, vector<16x64xf32> -> vector<16x64xf32>
    %c0_15 = arith.constant 0 : index
    %c0_16 = arith.constant 0 : index
    %c0_17 = arith.constant 0 : index
    %29 = vector.load %arg4[%c0_15, %c0_16, %c0_17] : memref<1x16x16xf32, #tpu.memory_space<vmem>>, vector<1x16x16xf32>
    %30 = vector.shape_cast %29 : vector<1x16x16xf32> to vector<16x16xf32>
    %31 = vector.shape_cast %13 : vector<16x16xf32> to vector<1x16x16xf32>
    tpu.vector_store %arg4[%c0_15, %c0_16, %c0_17], %31 {strides = array<i32>} : memref<1x16x16xf32, #tpu.memory_space<vmem>>, vector<1x16x16xf32>,
    %c0_18 = arith.constant 0 : index
    %c0_19 = arith.constant 0 : index
    %c0_20 = arith.constant 0 : index
    %32 = vector.load %arg5[%c0_18, %c0_19, %c0_20] : memref<1x16x16xf32, #tpu.memory_space<vmem>>, vector<1x16x16xf32>
    %33 = vector.shape_cast %32 : vector<1x16x16xf32> to vector<16x16xf32>
    %34 = vector.shape_cast %22 : vector<16x16xf32> to vector<1x16x16xf32>
    tpu.vector_store %arg5[%c0_18, %c0_19, %c0_20], %34 {strides = array<i32>} : memref<1x16x16xf32, #tpu.memory_space<vmem>>, vector<1x16x16xf32>,
    %c0_21 = arith.constant 0 : index
    %c0_22 = arith.constant 0 : index
    %c0_23 = arith.constant 0 : index
    %35 = vector.load %arg6[%c0_21, %c0_22, %c0_23] : memref<1x16x64xf32, #tpu.memory_space<vmem>>, vector<1x16x64xf32>
    %36 = vector.shape_cast %35 : vector<1x16x64xf32> to vector<16x64xf32>
    %37 = vector.shape_cast %25 : vector<16x64xf32> to vector<1x16x64xf32>
    tpu.vector_store %arg6[%c0_21, %c0_22, %c0_23], %37 {strides = array<i32>} : memref<1x16x64xf32, #tpu.memory_space<vmem>>, vector<1x16x64xf32>,
    %c0_24 = arith.constant 0 : index
    %c0_25 = arith.constant 0 : index
    %c0_26 = arith.constant 0 : index
    %38 = vector.load %arg7[%c0_24, %c0_25, %c0_26] : memref<1x16x64xf32, #tpu.memory_space<vmem>>, vector<1x16x64xf32>
    %39 = vector.shape_cast %38 : vector<1x16x64xf32> to vector<16x64xf32>
    %40 = vector.shape_cast %28 : vector<16x64xf32> to vector<1x16x64xf32>
    tpu.vector_store %arg7[%c0_24, %c0_25, %c0_26], %40 {strides = array<i32>} : memref<1x16x64xf32, #tpu.memory_space<vmem>>, vector<1x16x64xf32>,
    return
  }
  func.func @transform_0(%arg0: i32) -> (i32, i32, i32) {
    %c0_i32 = arith.constant 0 : i32
    %c0_i32_0 = arith.constant 0 : i32
    %c0_i32_1 = arith.constant 0 : i32
    return %arg0, %c0_i32, %c0_i32_0 : i32, i32, i32
  }
  func.func @transform_1(%arg0: i32) -> (i32, i32, i32) {
    %c0_i32 = arith.constant 0 : i32
    %c0_i32_0 = arith.constant 0 : i32
    %c0_i32_1 = arith.constant 0 : i32
    return %arg0, %c0_i32, %c0_i32_0 : i32, i32, i32
  }
  func.func @transform_2(%arg0: i32) -> (i32, i32, i32) {
    %c0_i32 = arith.constant 0 : i32
    %c0_i32_0 = arith.constant 0 : i32
    %c0_i32_1 = arith.constant 0 : i32
    return %arg0, %c0_i32, %c0_i32_0 : i32, i32, i32
  }
  func.func @transform_3(%arg0: i32) -> (i32, i32, i32) {
    %c0_i32 = arith.constant 0 : i32
    %c0_i32_0 = arith.constant 0 : i32
    %c0_i32_1 = arith.constant 0 : i32
    return %arg0, %c0_i32, %c0_i32_0 : i32, i32, i32
  }
  func.func @transform_4(%arg0: i32) -> (i32, i32, i32) {
    %c0_i32 = arith.constant 0 : i32
    %c0_i32_0 = arith.constant 0 : i32
    %c0_i32_1 = arith.constant 0 : i32
    return %arg0, %c0_i32, %c0_i32_0 : i32, i32, i32
  }
  func.func @transform_5(%arg0: i32) -> (i32, i32, i32) {
    %c0_i32 = arith.constant 0 : i32
    %c0_i32_0 = arith.constant 0 : i32
    %c0_i32_1 = arith.constant 0 : i32
    return %arg0, %c0_i32, %c0_i32_0 : i32, i32, i32
  }
  func.func @transform_6(%arg0: i32) -> (i32, i32, i32) {
    %c0_i32 = arith.constant 0 : i32
    %c0_i32_0 = arith.constant 0 : i32
    %c0_i32_1 = arith.constant 0 : i32
    return %arg0, %c0_i32, %c0_i32_0 : i32, i32, i32
  }
}

module attributes {stable_mosaic.version = 11 : i64} {
  func.func @output_fuse_kernel(%arg0: i32, %arg1: i32, %arg2: memref<1x4x256xf32, #tpu.memory_space<vmem>>, %arg3: memref<1x4x256xf32, #tpu.memory_space<vmem>>, %arg4: memref<1x4x256xf32, #tpu.memory_space<vmem>>, %arg5: memref<4x4xf32, #tpu.memory_space<vmem>>, %arg6: memref<4x1xf32, #tpu.memory_space<vmem>>, %arg7: memref<1x4x256xf32, #tpu.memory_space<vmem>>) attributes {dimension_semantics = [#tpu.dimension_semantics<parallel>, #tpu.dimension_semantics<parallel>], iteration_bounds = array<i64: 2, 1>, scalar_prefetch = 0 : i64, scratch_operands = 0 : i64, tpu.core_type = #tpu.core_type<tc>, window_params = [{transform_indices = @transform_0, window_bounds = array<i64: 1, 4, 256>}, {transform_indices = @transform_1, window_bounds = array<i64: 1, 4, 256>}, {transform_indices = @transform_2, window_bounds = array<i64: 1, 4, 256>}, {pipeline_mode = #tpu.pipeline_mode<synchronous>, transform_indices = @transform_3, window_bounds = array<i64: 4, 4>}, {pipeline_mode = #tpu.pipeline_mode<synchronous>, transform_indices = @transform_4, window_bounds = array<i64: 4, 1>}, {transform_indices = @transform_5, window_bounds = array<i64: 1, 4, 256>}]} {
    %c0 = arith.constant 0 : index
    %c0_0 = arith.constant 0 : index
    %c0_1 = arith.constant 0 : index
    %0 = vector.load %arg2[%c0, %c0_0, %c0_1] : memref<1x4x256xf32, #tpu.memory_space<vmem>>, vector<1x4x256xf32>
    %1 = vector.shape_cast %0 : vector<1x4x256xf32> to vector<4x256xf32>
    %c0_2 = arith.constant 0 : index
    %c0_3 = arith.constant 0 : index
    %c0_4 = arith.constant 0 : index
    %2 = vector.load %arg3[%c0_2, %c0_3, %c0_4] : memref<1x4x256xf32, #tpu.memory_space<vmem>>, vector<1x4x256xf32>
    %3 = vector.shape_cast %2 : vector<1x4x256xf32> to vector<4x256xf32>
    %4 = arith.addf %1, %3 : vector<4x256xf32>
    %c0_5 = arith.constant 0 : index
    %c0_6 = arith.constant 0 : index
    %5 = vector.load %arg5[%c0_5, %c0_6] : memref<4x4xf32, #tpu.memory_space<vmem>>, vector<4x4xf32>
    %cst = arith.constant dense<0.000000e+00> : vector<4x256xf32>
    %6 = tpu.matmul %5, %4, %cst {dimension_numbers = #tpu.dot_dimension_numbers<[1], [0], [0], [1], [0, 0, 1, 1], [], []>} : vector<4x4xf32>, vector<4x256xf32>, vector<4x256xf32> -> vector<4x256xf32>
    %c0_7 = arith.constant 0 : index
    %c0_8 = arith.constant 0 : index
    %7 = vector.load %arg6[%c0_7, %c0_8] : memref<4x1xf32, #tpu.memory_space<vmem>>, vector<4x1xf32>
    %8 = vector.broadcast %7 : vector<4x1xf32> to vector<4x256xf32>
    %9 = arith.addf %6, %8 : vector<4x256xf32>
    %cst_9 = arith.constant 2.000000e-01 : f32
    %10 = vector.broadcast %cst_9 : f32 to vector<4x256xf32>
    %11 = arith.mulf %10, %9 : vector<4x256xf32>
    %12 = arith.maximumf %9, %11 : vector<4x256xf32>
    %c0_10 = arith.constant 0 : index
    %c0_11 = arith.constant 0 : index
    %c0_12 = arith.constant 0 : index
    %13 = vector.load %arg4[%c0_10, %c0_11, %c0_12] : memref<1x4x256xf32, #tpu.memory_space<vmem>>, vector<1x4x256xf32>
    %14 = vector.shape_cast %13 : vector<1x4x256xf32> to vector<4x256xf32>
    %15 = arith.addf %14, %12 : vector<4x256xf32>
    %c0_13 = arith.constant 0 : index
    %c0_14 = arith.constant 0 : index
    %c0_15 = arith.constant 0 : index
    %16 = vector.load %arg7[%c0_13, %c0_14, %c0_15] : memref<1x4x256xf32, #tpu.memory_space<vmem>>, vector<1x4x256xf32>
    %17 = vector.shape_cast %16 : vector<1x4x256xf32> to vector<4x256xf32>
    %18 = vector.shape_cast %15 : vector<4x256xf32> to vector<1x4x256xf32>
    tpu.vector_store %arg7[%c0_13, %c0_14, %c0_15], %18 {strides = array<i32>} : memref<1x4x256xf32, #tpu.memory_space<vmem>>, vector<1x4x256xf32>,
    return
  }
  func.func @transform_0(%arg0: i32, %arg1: i32) -> (i32, i32, i32) {
    %c0_i32 = arith.constant 0 : i32
    %c0_i32_0 = arith.constant 0 : i32
    return %arg0, %c0_i32, %arg1 : i32, i32, i32
  }
  func.func @transform_1(%arg0: i32, %arg1: i32) -> (i32, i32, i32) {
    %c0_i32 = arith.constant 0 : i32
    %c0_i32_0 = arith.constant 0 : i32
    return %arg0, %c0_i32, %arg1 : i32, i32, i32
  }
  func.func @transform_2(%arg0: i32, %arg1: i32) -> (i32, i32, i32) {
    %c0_i32 = arith.constant 0 : i32
    %c0_i32_0 = arith.constant 0 : i32
    return %arg0, %c0_i32, %arg1 : i32, i32, i32
  }
  func.func @transform_3(%arg0: i32, %arg1: i32) -> (i32, i32) {
    %c0_i32 = arith.constant 0 : i32
    %c0_i32_0 = arith.constant 0 : i32
    %c0_i32_1 = arith.constant 0 : i32
    return %c0_i32, %c0_i32_0 : i32, i32
  }
  func.func @transform_4(%arg0: i32, %arg1: i32) -> (i32, i32) {
    %c0_i32 = arith.constant 0 : i32
    %c0_i32_0 = arith.constant 0 : i32
    %c0_i32_1 = arith.constant 0 : i32
    return %c0_i32, %c0_i32_0 : i32, i32
  }
  func.func @transform_5(%arg0: i32, %arg1: i32) -> (i32, i32, i32) {
    %c0_i32 = arith.constant 0 : i32
    %c0_i32_0 = arith.constant 0 : i32
    return %arg0, %c0_i32, %arg1 : i32, i32, i32
  }
}

</mosaic_0001>

<bundles_post_ra>
// kernel: squeeze.1
= control target key start
LH: loop header
LB: loop body
LE: loop exit
PB: predicated region body
PF: predicated region fallthrough
CT: control target
= control target key end

     0   :  { %vm11_vm0 = vcmask 130048   ;;  %s77_s10 = smov 80   ;;  %s78_s15 = smov 96   ;;  %s135_s0 = inlined_call_operand.vmem [shape: f32[2,256], index: 0, kind: input, shape index: {}]   ;;  %s136_s1 = inlined_call_operand.vmem [shape: f32[2,16,16], index: 1, kind: output, shape index: {}]  }
   0x1   :  { %v60_v0 = vld [vmem:[%s135_s0 + $0x2] sm:$0x3]  ;;  %v8_v1 = vld [vmem:[%s135_s0] sm:$0x3]  ;;  %s76_s0 = smov 112   ;;  %s79_s16 = smov 64  }
   0x2   :  { %7 = vst [vmem:[#allocation0 + $0x8] sm:$0x3] %v60_v0  ;;  %9 = vst [vmem:[#allocation0] sm:$0x3] %v8_v1  ;;  %s80_s17 = smov 48   ;;  %s81_s18 = smov 32  }
   0x3   :  { %s82_s19 = smov 16  }
   0x9   :  { %v18_v2 = vld.sshfl [vmem:[#allocation0] sm:$0xff pattern:$0x99999180]  }
   0xa   :  { %v10_v3 = vld [vmem:[#allocation0] sm:$0x3]   ;;  %19 = vrot.lane.b32.xlu0 %v18_v2, %s76_s0  ;;  %31 = vrot.lane.b32.xlu1 %v18_v2, %s77_s10  ;;  %v14_v4 = vld [vmem:[#allocation0 + $0x8] sm:$0x3]  }
   0xb   :  { %12 = vst.msk [vmem:[%s136_s1] ss:$16 sm:$0x3] %vm11_vm0, %v10_v3   ;;  %61 = vst.msk [vmem:[%s136_s1 + $0x8] ss:$16 sm:$0x3] %vm11_vm0, %v14_v4  }
   0xe   :  { %25 = vrot.lane.b32.xlu0 %v18_v2, %s78_s15  ;;  %37 = vrot.lane.b32.xlu1 %v18_v2, %s79_s16 }
  0x12   :  { %43 = vrot.lane.b32.xlu0 %v18_v2, %s80_s17  ;;  %49 = vrot.lane.b32.xlu1 %v18_v2, %s81_s18 }
  0x16   :  { %55 = vrot.lane.b32.xlu0 %v18_v2, %s82_s19 }
  0x7c   :  { %v20_v5 = vpop.permute.xlu0 %19   ;;  %v32_v6 = vpop.permute.xlu1 %31  }
  0x7d   :  { %62 = vst.msk [vmem:[%s136_s1 + $0x1] ss:$8 sm:$0xf] %vm11_vm0, %v20_v5   ;;  %64 = vst.msk [vmem:[%s136_s1 + $0x3] ss:$8 sm:$0xf] %vm11_vm0, %v32_v6  }
  0x80   :  { %v26_v7 = vpop.permute.xlu0 %25   ;;  %v38_v8 = vpop.permute.xlu1 %37  }
  0x81   :  { %63 = vst.msk [vmem:[%s136_s1 + $0x2] ss:$8 sm:$0xf] %vm11_vm0, %v26_v7   ;;  %65 = vst.msk [vmem:[%s136_s1 + $0x4] ss:$8 sm:$0xf] %vm11_vm0, %v38_v8  }
  0x84   :  { %v44_v9 = vpop.permute.xlu0 %43   ;;  %v50_v10 = vpop.permute.xlu1 %49  }
  0x85   :  { %66 = vst.msk [vmem:[%s136_s1 + $0x5] ss:$8 sm:$0xf] %vm11_vm0, %v44_v9   ;;  %67 = vst.msk [vmem:[%s136_s1 + $0x6] ss:$8 sm:$0xf] %vm11_vm0, %v50_v10  }
  0x88   :  { %v56_v11 = vpop.permute.xlu0 %55  }
  0x89   :  { %68 = vst.msk [vmem:[%s136_s1 + $0x7] ss:$8 sm:$0xf] %vm11_vm0, %v56_v11  }

// kernel: soam_forward.5
= control target key start
LH: loop header
LB: loop body
LE: loop exit
PB: predicated region body
PF: predicated region fallthrough
CT: control target
= control target key end

     0   :  { %s667_s18 = smov 0   ;;  %s669_s19 = smov 0   ;;  %s712_s0 = inlined_call_operand.vmem [shape: f32[2,4,256], index: 0, kind: input, shape index: {}]   ;;  %s713_s1 = inlined_call_operand.vmem [shape: f32[2,4,256], index: 1, kind: input, shape index: {}]   ;;  %s714_s2 = inlined_call_operand.vmem [shape: f32[2,4,256], index: 2, kind: input, shape index: {}]   ;;  %s715_s3 = inlined_call_operand.vmem [shape: f32[4,4], index: 3, kind: input, shape index: {}]   ;;  %s716_s4 = inlined_call_operand.vmem [shape: f32[4,1], index: 4, kind: input, shape index: {}]   ;;  %s717_s5 = inlined_call_operand.vmem [shape: f32[2,4,256], index: 5, kind: output, shape index: {}]  }
   0x1   :  { %s671_s20 = smov 0  }
   0x2 LB: > { %s27_s21 = sadd.s32 1, %s629_s19  ;;  %p566_p0 = scmp.ge.s32.totalorder %s633_s20, 1  ;;  %s633_s20 = sphi %s671_s20, %s15_s20   ;;  %s629_s19 = sphi %s669_s19, %s719_s19   ;;  %s625_s18 = sphi %s667_s18, %s718_s18  }
   0x3   : > { %p29_p1 = scmp.ge.s32.totalorder %s27_s21, 2  ;;  %p242_p2 = scmp.lt.s32.totalorder %s633_s20, 3 }
   0x5   : > { %s721_s21 = smov (%p29_p1, %s27_s21), 0  ;;  %p243_p3 = pnand %p566_p0, %p242_p2 }
   0x6   : > { %p297_p4 = scmp.lt.s32.totalorder (!%p243_p3), %s625_s18, 1  ;;  %v635_v0 = vmov (!%p243_p3), 0.0   ;;  %v340_v1 = vld [vmem:[%s716_s4] sm:$0xf] (!%p243_p3)  ;;  %v636_v2 = vmov (!%p243_p3), 0   ;;  %vm352_vm0 = vcmask (!%p243_p3), 1043456  }
   0x7   : > { %246 = sbr.rel (%p243_p3) target bundleno = 249 (0xf9), region = 40  ;;  %421 = vmatprep.mubr.f32.mxu0 (!%p243_p3), %v635_v0  ;;  %610 = vset.pattern.permute.xlu0 (!%p243_p3), %v636_v2  ;;  %v339_v7 = vld [vmem:[%s715_s3] sm:$0xf] (!%p243_p3)  ;;  %vm348_vm1 = vcmask (!%p243_p3), 31744  }
   0x8   : > { %343 = vperm.xlu0 (!%p243_p3), %610, %v340_v1  }
   0xe   : > { %s723_s18 = smov (!%p297_p4, %s625_s18), 1 }
   0xf   : > { %s580_s24 = sshll.u32 %s723_s18, 3 }
  0x10   : > { %s304_s27 = scalar_lea.vmem %s712_s0, %s580_s24  ;;  %s314_s30 = scalar_lea.vmem %s713_s1, %s580_s24 }
  0x11   : > { %v336_v3 = vld [vmem:[%s304_s27] sm:$0xff]  ;;  %s324_s10 = scalar_lea.vmem %s714_s2, %s580_s24  ;;  %s334_s13 = scalar_lea.vmem %s717_s5, %s580_s24 }
  0x12   : > { %v337_v4 = vld [vmem:[%s314_s30] sm:$0xff] }
  0x13   : > { %v338_v5 = vadd.f32 %v337_v4, %v336_v3  ;;  %v432_v17 = vld [vmem:[%s324_s10] sm:$0xff] }
  0x15   : > { %v347_v6 = vcombine.high %v338_v5, %v338_v5 }
  0x17   : > { %575 = vmatprep.subr.msk.mxu0 %vm352_vm0, %v347_v6 }
  0x18   : > { %576 = vmatpush1.msk.msra.mxu0 %vm352_vm0, %v338_v5 }
  0x19   : > { %577 = vmatmul.mubr.msk.f32.vlgmr.msra.gmra.mrb[0].mxu0 %vm348_vm1, %v339_v7 }
  0x87   : > { %v344_v8 = vpop.permute.xlu0 %343 }
  0xec   : > { %v423_v9 = vpop.f32.mrb[0].mxu0 }
  0xed   : > { %v424_v10 = vadd.f32 %v423_v9, %v344_v8  ;;  %v425_v11 = vpop.f32.mrb[1].mxu0 }
  0xee   : > { %v426_v12 = vadd.f32 %v425_v11, %v344_v8 }
  0xef   : > { %v428_v13 = vmul.f32 0.2, %v424_v10 }
  0xf0   : > { %v429_v14 = vmul.f32 0.2, %v426_v12 }
  0xf1   : > { %v430_v15 = vmax.f32 %v424_v10, %v428_v13 }
  0xf2   : > { %v431_v16 = vmax.f32 %v426_v12, %v429_v14 }
  0xf4   : > { %v435_v18 = vcombine.low %v430_v15, %v431_v16 }
  0xf6   : > { %v437_v19 = vadd.f32 %v435_v18, %v432_v17 }
  0xf8   : > { %438 = vst [vmem:[%s334_s13] sm:$0xff] %v437_v19 }
  0xf9 PF: > { %s15_s20 = sadd.s32 1, %s633_s20   ;;  %s718_s18 = smov %s629_s19 }
  0xfa   : > { %p12_p5 = scmp.ge.s32.totalorder %s15_s20, 4   ;;  %s719_s19 = smov %s721_s21 }
  0xfc   :  { %14 = sbr.rel (!%p12_p5) target bundleno = 2 (0x2), region = 76 }

// kernel: soam_forward.3
= control target key start
LH: loop header
LB: loop body
LE: loop exit
PB: predicated region body
PF: predicated region fallthrough
CT: control target
= control target key end

     0   :  { %s771_s23 = smov 0   ;;  %s773_s24 = smov 0   ;;  %s824_s0 = inlined_call_operand.vmem [shape: f32[2,4,256], index: 0, kind: input, shape index: {}]   ;;  %s825_s1 = inlined_call_operand.vmem [shape: f32[1,4], index: 1, kind: input, shape index: {}]   ;;  %s826_s2 = inlined_call_operand.<no memory space> [shape: f32[1,1], index: 2, kind: input, shape index: {}]   ;;  %s827_s3 = inlined_call_operand.vmem [shape: f32[4,4], index: 3, kind: input, shape index: {}]   ;;  %s828_s4 = inlined_call_operand.vmem [shape: f32[4,1], index: 4, kind: input, shape index: {}]   ;;  %s829_s5 = inlined_call_operand.vmem [shape: f32[2,1,256], index: 5, kind: output, shape index: {0}]   ;;  %s830_s6 = inlined_call_operand.vmem [shape: f32[2,4,256], index: 6, kind: output, shape index: {1}]  }
   0x1   :  { %v12_v0 = vstv %s826_s2  ;;  %s775_s25 = smov 0  }
   0x2   :  { %13 = vst [vmem:[#allocation2] sm:$0x1] %v12_v0 }
   0x3 LB: > { %s31_s2 = sadd.s32 1, %s724_s24  ;;  %p661_p0 = scmp.ge.s32.totalorder %s728_s25, 1  ;;  %s728_s25 = sphi %s775_s25, %s19_s25   ;;  %s724_s24 = sphi %s773_s24, %s832_s24   ;;  %s720_s23 = sphi %s771_s23, %s831_s23  }
   0x4   : > { %p33_p1 = scmp.ge.s32.totalorder %s31_s2, 2  ;;  %p240_p2 = scmp.lt.s32.totalorder %s728_s25, 3 }
   0x6   : > { %s834_s2 = smov (%p33_p1, %s31_s2), 0  ;;  %p241_p3 = pnand %p661_p0, %p240_p2 }
   0x7   : > { %p287_p4 = scmp.lt.s32.totalorder (!%p241_p3), %s720_s23, 1  ;;  %v730_v1 = vmov (!%p241_p3), 0.0   ;;  %v731_v3 = vmov (!%p241_p3), 0   ;;  %v414_v4 = vld [vmem:[%s828_s4] sm:$0xf] (!%p241_p3)  ;;  %vm333_vm0 = vcmask (!%p241_p3), 1043456   ;;  %v323_v9 = vlaneseq (!%p241_p3) }
   0x8   : > { %244 = sbr.rel (%p241_p3) target bundleno = 249 (0xf9), region = 40  ;;  %402 = vmatprep.mubr.f32.mxu0 (!%p241_p3), %v730_v1  ;;  %487 = vmatprep.mubr.f32.mxu1 (!%p241_p3), %v730_v1  ;;  %v316_v7 = vld [vmem:[%s825_s1] sm:$0x1] (!%p241_p3)  ;;  %vm329_vm1 = vcmask (!%p241_p3), 31744   ;;  %v732_v14 = vmov (!%p241_p3), 1966171168  }
   0x9   : > { %v317_v2 = vld [vmem:[#allocation2] sm:$0x1] (!%p241_p3)  ;;  %704 = vset.pattern.permute.xlu0 (!%p241_p3), %v731_v3  ;;  %v324_v10 = vshrl.u32 (!%p241_p3), %v323_v9, 7  ;;  %v502_v15 = vunpack.c.l.s4 (!%p241_p3), %v732_v14  ;;  %vm518_vm2 = vcmp.lt.s32.totalorder (!%p241_p3), %v323_v9, 256 }
   0xa   : > { %320 = vperm.xlu0 (!%p241_p3), %704, %v317_v2   ;;  %v413_v8 = vld [vmem:[%s827_s3] sm:$0xf] (!%p241_p3) }
   0xb   : > { %v325_v12 = vsub.s32 (!%p241_p3), 0, %v324_v10  ;;  %v503_v23 = vunpack.c.0.s8 (!%p241_p3), %v502_v15 }
   0xd   : > { %v506_v32 = vsub.s32 (!%p241_p3), %v503_v23, %v324_v10 }
   0xe   : > { %417 = vperm.xlu0 (!%p241_p3), %704, %v414_v4  }
   0xf   : > { %s836_s23 = smov (!%p287_p4, %s720_s23), 1 }
  0x10   : > { %s675_s26 = sshll.u32 %s836_s23, 3  ;;  %s664_s15 = sshll.u32 %s836_s23, 1 }
  0x11   : > { %s294_s7 = scalar_lea.vmem %s824_s0, %s675_s26  ;;  %s313_s14 = scalar_lea.vmem %s830_s6, %s675_s26 }
  0x12   : > { %v315_v5 = vld [vmem:[%s294_s7] sm:$0xff]  ;;  %s303_s18 = scalar_lea.vmem %s829_s5, %s664_s15 }
  0x13   : > { %v328_v6 = vcombine.high %v315_v5, %v315_v5 }
  0x15   : > { %667 = vmatprep.subr.msk.mxu0 %vm333_vm0, %v328_v6  ;;  %670 = vmatprep.subr.msk.mxu1 %vm333_vm0, %v328_v6 }
  0x16   : > { %668 = vmatpush1.msk.msra.mxu0 %vm333_vm0, %v315_v5  ;;  %671 = vmatpush1.msk.msra.mxu1 %vm333_vm0, %v315_v5 }
  0x17   : > { %669 = vmatmul.mubr.msk.f32.vlgmr.msra.gmra.mrb[0].mxu0 %vm329_vm1, %v316_v7  ;;  %672 = vmatmul.mubr.msk.f32.vlgmr.msra.gmra.mrb[0].mxu1 %vm329_vm1, %v413_v8 }
  0x89   : > { %v321_v11 = vpop.permute.xlu0 %320 }
  0x8a   : > { %v326_v13 = vrot.slane %v321_v11, %v325_v12 }
  0x8d   : > { %v418_v16 = vpop.permute.xlu0 %417 }
  0xea   : > { %v404_v17 = vpop.f32.mrb[0].mxu0  ;;  %v489_v18 = vpop.f32.mrb[0].mxu1 }
  0xeb   : > { %v405_v19 = vadd.f32 %v404_v17, %v326_v13  ;;  %v490_v20 = vadd.f32 %v489_v18, %v418_v16  ;;  %v406_v21 = vpop.f32.mrb[1].mxu0  ;;  %v491_v22 = vpop.f32.mrb[1].mxu1 }
  0xec   : > { %v407_v24 = vadd.f32 %v406_v21, %v326_v13  ;;  %v492_v25 = vadd.f32 %v491_v22, %v418_v16 }
  0xed   : > { %v409_v26 = vmul.f32 0.2, %v405_v19  ;;  %v494_v27 = vmul.f32 0.2, %v490_v20 }
  0xee   : > { %v410_v28 = vmul.f32 0.2, %v407_v24  ;;  %v495_v29 = vmul.f32 0.2, %v492_v25 }
  0xef   : > { %v411_v30 = vmax.f32 %v405_v19, %v409_v26  ;;  %v496_v31 = vmax.f32 %v490_v20, %v494_v27 }
  0xf0   : > { %v412_v33 = vmax.f32 %v407_v24, %v410_v28  ;;  %v497_v34 = vmax.f32 %v492_v25, %v495_v29 }
  0xf2   : > { %v500_v35 = vcombine.low %v411_v30, %v412_v33  ;;  %v523_v36 = vcombine.low %v496_v31, %v497_v34 }
  0xf4   : > { %v507_v37 = vrot.slane %v500_v35, %v506_v32  ;;  %525 = vst [vmem:[%s313_s14] sm:$0xff] %v523_v36 }
  0xf6   : > { %v514_v38 = vrot.slane %v507_v37, %v506_v32 }
  0xf8   : > { %520 = vst.msk [vmem:[%s303_s18] sm:$0x3] %vm518_vm2, %v514_v38 }
  0xf9 PF: > { %s19_s25 = sadd.s32 1, %s728_s25   ;;  %s831_s23 = smov %s724_s24 }
  0xfa   : > { %p16_p5 = scmp.ge.s32.totalorder %s19_s25, 4   ;;  %s832_s24 = smov %s834_s2 }
  0xfc   :  { %18 = sbr.rel (!%p16_p5) target bundleno = 3 (0x3), region = 82 }

// kernel: soam_forward.4
= control target key start
LH: loop header
LB: loop body
LE: loop exit
PB: predicated region body
PF: predicated region fallthrough
CT: control target
= control target key end

     0   :  { %s1448_s0 = inlined_call_operand.vmem [shape: f32[2,16,16], index: 0, kind: input, shape index: {}]   ;;  %s1449_s1 = inlined_call_operand.vmem [shape: f32[2,16,64], index: 1, kind: input, shape index: {}, may-alias: {1,2}]   ;;  %s1450_s2 = inlined_call_operand.vmem [shape: f32[2,16,64], index: 2, kind: input, shape index: {}, may-alias: {1,2}]   ;;  %s1451_s3 = inlined_call_operand.hbm [shape: f32[2,16,16], index: 3, kind: output, shape index: {0}]   ;;  %s1452_s4 = inlined_call_operand.hbm [shape: f32[2,16,16], index: 4, kind: output, shape index: {1}]   ;;  %s1453_s5 = inlined_call_operand.vmem [shape: f32[2,16,64], index: 5, kind: output, shape index: {2}]   ;;  %s1454_s6 = inlined_call_operand.vmem [shape: f32[2,16,64], index: 6, kind: output, shape index: {3}]  }
   0x1   :  { %1455 = sst [smem:[#allocation8_spill]] %s1448_s0 }
   0x2   :  { %12 = vsyncpa [#allocation3], 0 }
   0x3   :  { %14 = vsyncpa [#allocation3 + $0x1], 0 }
   0x4   :  { %15 = vsyncpa [#allocation5], 0 }
   0x5   :  { %17 = vsyncpa [#allocation5 + $0x1], 0  ;;  %s1257_s21 = smov 0   ;;  %s1259_s22 = smov 0  }
   0x6   :  { %s1261_s23 = smov 0   ;;  %s1263_s24 = smov 0  }
   0x7 LB: > { %s1278_s25 = sadd.s32 4294967295, %s1216_s24   ;;  %s960_s26 = sadd.s32 4294967294, %s1216_s24   ;;  %s1216_s24 = sphi %s1263_s24, %s1462_s24   ;;  %s1212_s23 = sphi %s1261_s23, %s1461_s23   ;;  %s1208_s22 = sphi %s1259_s22, %s1460_s22   ;;  %s1204_s21 = sphi %s1257_s21, %s1459_s21  }
   0x8   : > { %s1282_s27 = sadd.s32 1, %s1216_s24   ;;  %s108_s28 = sadd.s32 1, %s1212_s23 }
   0x9   : > { %s105_s29 = ssub.s32 %s1216_s24, %s1282_s27  ;;  %p118_p0 = scmp.ne.s32.totalorder %s1212_s23, %s1208_s22 }
   0xa   : > { %p106_p1 = scmp.eq.s32.totalorder %s105_s29, 0  ;;  %p119_p2 = scmp.eq.s32.totalorder %s1278_s25, 1 }
   0xb   : > { %p124_p3 = scmp.ne.s32.totalorder %s1208_s22, %s1204_s21  ;;  %p125_p4 = scmp.eq.s32.totalorder %s960_s26, 1 }
   0xc   : > { %s1293_s30 = scalar_select %p106_p1, %s1212_s23, %s108_s28  }
   0xd   : > { %p1295_p5 = por %p119_p2, %p118_p0  ;;  %p1299_p6 = por %p125_p4, %p124_p3 }
   0xe   : > { %p963_p7 = scmp.ge.s32.totalorder %s1216_s24, 1  ;;  %p245_p8 = scmp.lt.s32.totalorder %s1216_s24, 3 }
  0x10   : > { %p246_p9 = pnand %p963_p7, %p245_p8 }
  0x11   : > { %p300_p10 = scmp.lt.s32.totalorder (!%p246_p9), %s1278_s25, 1  ;;  %s1458_s0 = sld [smem:[#allocation8_spill]] (!%p246_p9)  ;;  %vm359_vm0 = vcmask (!%p246_p9), 130048  }
  0x12   : > { %249 = sbr.rel (%p246_p9) target bundleno = 917 (0x395), region = 32  ;;  %s1334_s20 = sand.u32 (!%p246_p9), 1, %s1208_s22  }
  0x13   : > { %s964_s26 = sshll.u32 (!%p246_p9), %s1334_s20, 4  ;;  %s742_s15 = scalar_lea.sflag (!%p246_p9), [#allocation3], %s1334_s20 }
  0x14   : > { %s1338_s28 = scalar_lea.vmem (!%p246_p9), [#allocation4], %s964_s26  ;;  %s278_s29 = scalar_lea.vmem (!%p246_p9), [#allocation2], %s964_s26 }
  0x15   : > { %s770_s11 = sshll.u32 (!%p246_p9), %s278_s29, 4  ;;  %s1218_s17 = smov (!%p246_p9), [#allocation2]   ;;  %s1357_s11 = int_to_ptr.vmem [resolvable:$true] %s770_s11 }
  0x16   : > { %s1126_s18 = sshll.u32 (!%p246_p9), %s1218_s17, 4  ;;  %s1127_s18 = int_to_ptr.vmem [resolvable:$false] %s1126_s18 }
  0x17   : > { %p1129_p0 = scmp.lt.s32.totalorder (!%p246_p9), %s1357_s11, %s1127_s18 }
  0x19   : > { %s301_s9 = scalar_select %p300_p10, %s1278_s25, 1 }
  0x1b   : > { %s1307_s10 = sshll.u32 %s301_s9, 4  ;;  %s997_s9 = sshll.u32 %s1278_s25, 8 }
  0x1c   : > { %s304_s13 = scalar_lea.vmem %s1458_s0, %s1307_s10  ;;  %s309_s16 = scalar_lea.vmem %s1449_s1, %s1307_s10 }
  0x1d   : > { %v325_v0 = vld [vmem:[%s304_s13] sm:$0xff]  ;;  %v326_v1 = vld [vmem:[%s304_s13 + $0x8] sm:$0xff]  ;;  %s314_s19 = scalar_lea.vmem %s1450_s2, %s1307_s10  ;;  %s1355_s14 = scalar_lea.hbm %s1451_s3, %s997_s9 }
  0x1e   : > { %327 = vxpose.xlu0.b32.start [1/2] (short) (narrow) %v325_v0, 16  ;;  %v1047_v2 = vpack.c.bf16 %v326_v1, %v325_v0  ;;  %1019 = vmatprep.mubr.msk.f32.mxu0 %vm359_vm0, %v325_v0  ;;  %v566_v34 = vld [vmem:[%s309_s16] sm:$0xff]  ;;  %v567_v35 = vld [vmem:[%s309_s16 + $0x8] sm:$0xff]  ;;  %s1122_s16 = scalar_lea.vmem %s1357_s11, 256 }
  0x1f   : > { %v1051_v36 = vpack.c.bf16 %v567_v35, %v566_v34  ;;  %v649_v37 = vld [vmem:[%s314_s19] sm:$0xff]  ;;  %v650_v38 = vld [vmem:[%s314_s19 + $0x8] sm:$0xff]  ;;  %p1123_p11 = scmp.ne.s32.totalorder %s1357_s11, %s1122_s16  ;;  %s1128_s19 = scalar_lea.vmem %s1127_s18, 512 }
  0x20   : > { %1048 = vmatprep.subr.bf16.mxu1 %v1047_v2  ;;  %v1055_v39 = vpack.c.bf16 %v650_v38, %v649_v37  ;;  %p1130_p1 = scmp.lt.s32.totalorder %s1128_s19, %s1122_s16 }
  0x21   : > { %1050 = vmatpush3.bf16.msra.mxu1 %v1047_v2  ;;  %p1124_p12 = pnand %p1123_p11, %p1295_p5 }
  0x22   : > { %328 = vxpose.xlu0.b32.end [2/2] (short) (narrow) %v326_v1, 16  ;;  %1056 = vmatprep.subr.bf16.mxu1 %v1055_v39  ;;  %p1131_p2 = por %p1130_p1, %p1129_p0 }
  0x23   : > { %p1125_p13 = pneg %p1124_p12 }
  0x25   : > { %p1132_p3 = pnand %p1131_p2, %p1125_p13 }
  0x9e   : > { %v343_v3 = vpop.trf.xlu0 }
  0x9f   : > { %1026 = vmatprep.mubr.msk.f32.mxu1 %vm359_vm0, %v343_v3 }
  0xa2   : > { %v344_v4 = vpop.trf.xlu0 }
  0xa3   : > { %1027 = vmatmul.mubr.msk.f32.vlgmr.msra.gmra.mrb[0].mxu1 %vm359_vm0, %v344_v4  ;;  %v1043_v5 = vpack.c.bf16 %v344_v4, %v343_v3 }
  0xa4   : > { %1058 = vmatpush3.bf16.msra.mxu1 %v1055_v39 }
  0xa5   : > { %1044 = vmatprep.subr.bf16.mxu0 %v1043_v5 }
  0xa6   : > { %1046 = vmatpush3.bf16.msra.mxu0 %v1043_v5 }
  0xa7   : > { %1052 = vmatprep.subr.bf16.mxu0 %v1051_v36 }
  0xa9   : > { %1020 = vmatmul.mubr.msk.f32.vlgmr.msra.gmra.mrb[0].mxu0 %vm359_vm0, %v326_v1 }
  0xaa   : > { %1054 = vmatpush3.bf16.msra.mxu0 %v1051_v36 }
 0x176   : > { %v1028_v6 = vpop.f32.mrb[0].mxu1 }
 0x177   : > { %v513_v7 = vpop.f32.mrb[1].mxu1  ;;  %v547_v13 = vsel %vm359_vm0, %v1028_v6, -inf }
 0x178   : > { %v544_v8 = vsel %vm359_vm0, %v513_v7, -inf }
 0x179   : > { %545 = vmax.xlane.f32.xlu1 %v544_v8 }
 0x17c   : > { %v1021_v9 = vpop.f32.mrb[0].mxu0 }
 0x17d   : > { %v432_v10 = vpop.f32.mrb[1].mxu0  ;;  %v525_v11 = vsel %vm359_vm0, %v1021_v9, -inf }
 0x17e   : > { %526 = vmax.xlane.f32.xlu0 %v525_v11  ;;  %v522_v12 = vsel %vm359_vm0, %v432_v10, -inf }
 0x17f   : > { %523 = vmax.xlane.f32.xlu1 %v522_v12 }
 0x183   : > { %548 = vmax.xlane.f32.xlu1 %v547_v13 }
 0x206   : > { %v546_v14 = vpop.xlane.xlu1 %545 }
 0x207   : > { %v550_v15 = vsub.f32 %v513_v7, %v546_v14 }
 0x209   : > { %v552_v16 = vmul.f32 1.442695, %v550_v15 }
 0x20b   : > { %1106 = vpow2.f32 %v552_v16  ;;  %v527_v17 = vpop.xlane.xlu0 %526 }
 0x20c   : > { %v529_v18 = vsub.f32 %v1021_v9, %v527_v17  ;;  %v524_v19 = vpop.xlane.xlu1 %523 }
 0x20d   : > { %v528_v20 = vsub.f32 %v432_v10, %v524_v19 }
 0x20e   : > { %v532_v21 = vmul.f32 1.442695, %v529_v18 }
 0x20f   : > { %v530_v22 = vmul.f32 1.442695, %v528_v20 }
 0x210   : > { %1108 = vpow2.f32 %v532_v21  ;;  %v549_v23 = vpop.xlane.xlu1 %548 }
 0x211   : > { %v551_v24 = vsub.f32 %v1028_v6, %v549_v23  ;;  %1110 = vpow2.f32 %v530_v22 }
 0x213   : > { %v554_v25 = vmul.f32 1.442695, %v551_v24 }
 0x215   : > { %v1107_v26 = vpop.eup %1106  ;;  %1112 = vpow2.f32 %v554_v25 }
 0x216   : > { %v556_v27 = vsel %vm359_vm0, %v1107_v26, 0.0 }
 0x217   : > { %557 = vadd.xlane.f32.xlu1 %v556_v27 }
 0x21a   : > { %v1109_v28 = vpop.eup %1108 }
 0x21b   : > { %v537_v29 = vsel %vm359_vm0, %v1109_v28, 0.0  ;;  %v1111_v30 = vpop.eup %1110 }
 0x21c   : > { %538 = vadd.xlane.f32.xlu1 %v537_v29  ;;  %v534_v31 = vsel %vm359_vm0, %v1111_v30, 0.0 }
 0x21f   : > { %v1113_v32 = vpop.eup %1112 }
 0x220   : > { %535 = vadd.xlane.f32.xlu1 %v534_v31  ;;  %v559_v33 = vsel %vm359_vm0, %v1113_v32, 0.0 }
 0x224   : > { %560 = vadd.xlane.f32.xlu1 %v559_v33 }
 0x2a4   : > { %v558_v40 = vpop.xlane.xlu1 %557 }
 0x2a5   : > { %1114 = vrcp.f32 %v558_v40 }
 0x2a9   : > { %v539_v41 = vpop.xlane.xlu1 %538 }
 0x2aa   : > { %1116 = vrcp.f32 %v539_v41 }
 0x2ad   : > { %v536_v42 = vpop.xlane.xlu1 %535 }
 0x2ae   : > { %1118 = vrcp.f32 %v536_v42 }
 0x2af   : > { %v1115_v43 = vpop.eup %1114 }
 0x2b0   : > { %v563_v44 = vmul.f32 %v1115_v43, %v1107_v26 }
 0x2b1   : > { %v561_v45 = vpop.xlane.xlu1 %560 }
 0x2b2   : > { %1120 = vrcp.f32 %v561_v45  ;;  %1040 = vmatprep.mubr.msk.f32.mxu1 %vm359_vm0, %v563_v44  ;;  %734 = vst.msk [vmem:[%s1338_s28] sm:$0xff] %vm359_vm0, %v563_v44 }
 0x2b4   : > { %v1117_v46 = vpop.eup %1116 }
 0x2b5   : > { %v543_v47 = vmul.f32 %v1117_v46, %v1109_v28 }
 0x2b7   : > { %733 = vst.msk [vmem:[%s278_s29 + $0x8] sm:$0xff] %vm359_vm0, %v543_v47 }
 0x2b8   : > { %v1119_v48 = vpop.eup %1118 }
 0x2b9   : > { %v541_v49 = vmul.f32 %v1119_v48, %v1111_v30 }
 0x2bb   : > { %1033 = vmatprep.mubr.msk.f32.mxu0 %vm359_vm0, %v541_v49  ;;  %732 = vst.msk [vmem:[%s278_s29] sm:$0xff] %vm359_vm0, %v541_v49 }
 0x2bc   : > { %v1121_v50 = vpop.eup %1120  ;;  %1034 = vmatmul.mubr.msk.f32.vlgmr.msra.gmra.mrb[2].mxu0 %vm359_vm0, %v543_v47 }
 0x2bd   : > { %v565_v51 = vmul.f32 %v1121_v50, %v1113_v32 }
 0x2bf   : > { %1041 = vmatmul.mubr.msk.f32.vlgmr.msra.gmra.mrb[2].mxu1 %vm359_vm0, %v565_v51  ;;  %735 = vst.msk [vmem:[%s1338_s28 + $0x8] sm:$0xff] %vm359_vm0, %v565_v51 }
 0x2c0   : > { %1135 = shalt.err (!%p1132_p3)
}
 0x2c1   : > { %s1136_s26 = scalar_lea.hbm %s1355_s14, 256  ;;  %s1140_s13 = scalar_lea.hbm %s1451_s3, 512 }
 0x2c2   : > { %p1137_p4 = scmp.ne.s32.totalorder %s1355_s14, %s1136_s26  ;;  %p1141_p9 = scmp.lt.u32.totalorder %s1355_s14, %s1451_s3 }
 0x2c3   : > { %p1142_p10 = scmp.lt.u32.totalorder %s1140_s13, %s1136_s26  ;;  %p1144_p12 = scmp.lt.u32.totalorder %s1136_s26, %s1355_s14 }
 0x2c4   : > { %p1138_p7 = pnand %p1137_p4, %p1295_p5 }
 0x2c5   : > { %p1143_p11 = por %p1142_p10, %p1141_p9 }
 0x2c6   : > { %p1139_p8 = pneg %p1138_p7 }
 0x2c7   : > { %p1145_p13 = por %p1144_p12, %p1143_p11 }
 0x2c9   : > { %p1146_p0 = pnand %p1145_p13, %p1139_p8 }
 0x2cb   : > { %1149 = shalt.err (!%p1146_p0)
}
 0x2cc   : > { %s1219_s16 = smov 128   ;;  %s1220_s19 = smov 8  }
 0x2cd   : > { %1059 = dma.vmem_to_hbm [thread:$0]  (%p1295_p5), %s1357_s11, 256, %s1355_s14, %s742_s15, %s1219_s16, %s1219_s16, %s1220_s19  }
 0x2ce   : > { %s1391_s12 = scalar_lea.hbm %s1452_s4, %s997_s9  ;;  %s786_s13 = sshll.u32 %s1338_s28, 4  ;;  %s1394_s13 = int_to_ptr.vmem [resolvable:$true] %s786_s13 }
 0x2cf   : > { %s747_s17 = scalar_lea.sflag [#allocation5], %s1334_s20  ;;  %s1150_s18 = scalar_lea.vmem %s1394_s13, 256 }
 0x2d0   : > { %p1151_p1 = scmp.ne.s32.totalorder %s1394_s13, %s1150_s18  ;;  %s1221_s0 = smov [#allocation4]  }
 0x2d1   : > { %s1154_s11 = sshll.u32 %s1221_s0, 4  ;;  %s1155_s11 = int_to_ptr.vmem [resolvable:$false] %s1154_s11 }
 0x2d2   : > { %p1152_p2 = pnand %p1151_p1, %p1295_p5  ;;  %s1156_s25 = scalar_lea.vmem %s1155_s11, 512 }
 0x2d3   : > { %p1157_p4 = scmp.lt.s32.totalorder %s1394_s13, %s1155_s11  ;;  %p1158_p7 = scmp.lt.s32.totalorder %s1156_s25, %s1150_s18 }
 0x2d4   : > { %p1153_p3 = pneg %p1152_p2 }
 0x2d5   : > { %p1159_p8 = por %p1158_p7, %p1157_p4 }
 0x2d7   : > { %p1160_p9 = pnand %p1159_p8, %p1153_p3 }
 0x2d9   : > { %1163 = shalt.err (!%p1160_p9)
}
 0x2da   : > { %s1164_s28 = scalar_lea.hbm %s1391_s12, 256  ;;  %s1168_s0 = scalar_lea.hbm %s1452_s4, 512 }
 0x2db   : > { %p1165_p10 = scmp.ne.s32.totalorder %s1391_s12, %s1164_s28  ;;  %p1169_p13 = scmp.lt.u32.totalorder %s1391_s12, %s1452_s4 }
 0x2dc   : > { %p1170_p0 = scmp.lt.u32.totalorder %s1168_s0, %s1164_s28  ;;  %p1172_p2 = scmp.lt.u32.totalorder %s1164_s28, %s1391_s12 }
 0x2dd   : > { %p1166_p11 = pnand %p1165_p10, %p1295_p5 }
 0x2de   : > { %p1171_p1 = por %p1170_p0, %p1169_p13 }
 0x2df   : > { %p1167_p12 = pneg %p1166_p11 }
 0x2e0   : > { %p1173_p3 = por %p1172_p2, %p1171_p1 }
 0x2e2   : > { %p1174_p4 = pnand %p1173_p3, %p1167_p12 }
 0x2e4   : > { %1177 = shalt.err (!%p1174_p4)
}
 0x2e5   : > { %1060 = dma.vmem_to_hbm [thread:$0]  (%p1295_p5), %s1394_s13, 256, %s1391_s12, %s747_s17, %s1219_s16, %s1219_s16, %s1220_s19   ;;  %vm736_vm1 = vcmask 523264  }
 0x2e6   : > { %s319_s11 = scalar_lea.vmem %s1453_s5, %s1307_s10  ;;  %s324_s28 = scalar_lea.vmem %s1454_s6, %s1307_s10 }
 0x38f   : > { %v1035_v52 = vpop.f32.mrb[2].mxu0 }
 0x390   : > { %738 = vst.msk [vmem:[%s319_s11 + $0x8] sm:$0xff] %vm736_vm1, %v1035_v52  ;;  %v640_v53 = vpop.f32.mrb[3].mxu0 }
 0x391   : > { %737 = vst.msk [vmem:[%s319_s11] sm:$0xff] %vm736_vm1, %v640_v53 }
 0x392   : > { %v1042_v54 = vpop.f32.mrb[2].mxu1 }
 0x393   : > { %740 = vst.msk [vmem:[%s324_s28 + $0x8] sm:$0xff] %vm736_vm1, %v1042_v54  ;;  %v723_v55 = vpop.f32.mrb[3].mxu1 }
 0x394   : > { %739 = vst.msk [vmem:[%s324_s28] sm:$0xff] %vm736_vm1, %v723_v55 }
 0x395 PF: > { %p1070_p5 = scmp.ge.s32.totalorder %s1216_s24, 2  ;;  %s807_s20 = sand.u32 1, %s1204_s21  }
 0x396   : > { %s808_s16 = scalar_lea.sflag [#allocation3], %s807_s20 }
 0x397   : > { %p1064_p7 = pnand %p1070_p5, %p1299_p6 }
 0x399   : > { %1195 = dma.done.wait (!%p1064_p7), %s808_s16, 256  }
 0x39a   : > { %1197 = vsyncadd (!%p1064_p7), %s808_s16, 4294967040  ;;  %s817_s19 = scalar_lea.sflag [#allocation5], %s807_s20 }
 0x39b   : > { %1199 = dma.done.wait (!%p1064_p7), %s817_s19, 256  }
 0x39c   : > { %1201 = vsyncadd (!%p1064_p7), %s817_s19, 4294967040  ;;  %p20_p8 = scmp.ge.s32.totalorder %s1282_s27, 4   ;;  %s1459_s21 = smov %s1208_s22 }
 0x39d   : > { %s1460_s22 = smov %s1212_s23  ;;  %s1461_s23 = smov %s1293_s30 }
 0x39e   : > { %s1462_s24 = smov %s1282_s27  ;;  %22 = sbr.rel (!%p20_p8) target bundleno = 7 (0x7), region = 114 }
 0x3a5   :  { %838 = vsyncpa [#allocation3], 1 }
 0x3a6   :  { %840 = vsyncpa [#allocation3 + $0x1], 1 }
 0x3a7   :  { %841 = vsyncpa [#allocation5], 1 }
 0x3a8   :  { %843 = vsyncpa [#allocation5 + $0x1], 1 }

</bundles_post_ra>
